<compile_context>
chip_gen: v6e
topology: v6e:2x2x1
jax: 0.10.0
libtpu: 0.0.40
codegen_flags: <defaults>
</compile_context>

<pallas_src>
import jax
import jax.numpy as jnp
from jax.experimental import pallas as pl
from jax.experimental.pallas import tpu as pltpu

# ----- problem sizes (small, consistent with a conv forward) -----
N, C_IN, H, W = 2, 4, 16, 16
C_OUT = 8
KH = KW = 3
CONS_WEIGHT = 0.5

HP = H + 2                           # padded height (pad=1)
WP = W + 2                           # padded width  (pad=1)
ROWS = N * H                         # 32   (sublane axis of the dense head view)
LANES = W * C_OUT                    # 128  (lane axis of the dense head view)
TAPK = W * C_IN                      # 64   (per-tap GEMM contraction)
KCOLS = KH * KW * TAPK               # 576  (total contraction)
INV_NUM = 1.0 / float(N * H * W * C_OUT)
_CONV_FLOPS = 2 * ROWS * KCOLS * LANES


# ---------------------------------------------------------------------------
# In-kernel conv:  im2col via 9 static shifted slices of the padded input,
# accumulated as 9 MXU matmuls against row-blocks of the block-diagonal weight.
# ---------------------------------------------------------------------------
def _conv_bias_relu(xpad_ref, wbd_ref, b_ref):
    # xpad_ref : (36, 72)  padded NHWC input, row = n*HP + h_pad, col = w_pad*C_IN + cin
    # wbd_ref  : (576,128) block-diag weights, row = (kh,kw,w,cin), col = (w,c_out)
    # b_ref    : (1, 128)  bias tiled across W
    xp = xpad_ref[...]                                      # ~10 KB, stays in vregs
    acc = jnp.zeros((ROWS, LANES), jnp.float32)
    for kh in range(KH):
        for kw in range(KW):
            t = kh * KW + kw
            top = xp[kh:kh + H, kw * C_IN:kw * C_IN + TAPK]            # n = 0
            bot = xp[HP + kh:HP + kh + H, kw * C_IN:kw * C_IN + TAPK]  # n = 1
            xt = jnp.concatenate([top, bot], axis=0)                   # (32, 64)
            acc = acc + jnp.dot(xt, wbd_ref[t * TAPK:(t + 1) * TAPK, :],
                                preferred_element_type=jnp.float32)
    return jnp.maximum(acc + b_ref[...], 0.0)               # bias + ReLU, lane-dense


def fwd_only_kernel(xpad_ref, wbd_ref, b_ref, head_ref):
    head_ref[...] = _conv_bias_relu(xpad_ref, wbd_ref, b_ref)


def fwd_loss_kernel(xpad_ref, wbd_ref, b_ref, tgt_ref, pre_ref, head_ref, loss_ref):
    h = _conv_bias_relu(xpad_ref, wbd_ref, b_ref)
    head_ref[...] = h                                       # unmasked 128-lane stores
    d = h - tgt_ref[...]                                    # detection residual
    c = h - pre_ref[...]                                    # temporal-consistency residual
    det = jnp.sum(d * d) * INV_NUM
    cons = jnp.sum(c * c) * INV_NUM
    loss_ref[0, 0] = det + CONS_WEIGHT * cons               # combined loss in-kernel
    loss_ref[0, 1] = det
    loss_ref[0, 2] = cons


_VMEM = pl.BlockSpec(memory_space=pltpu.MemorySpace.VMEM)
_SMEM = pl.BlockSpec(memory_space=pltpu.MemorySpace.SMEM)


def _fwd_loss_call(xpad2d, wbd, b_dense, tgt_dense, pre_dense):
    bytes_accessed = 4 * (xpad2d.size + wbd.size + b_dense.size + tgt_dense.size +
                          pre_dense.size + ROWS * LANES + 3)
    return pl.pallas_call(
        fwd_loss_kernel,
        out_shape=(
            jax.ShapeDtypeStruct((ROWS, LANES), jnp.float32),   # head (dense view)
            jax.ShapeDtypeStruct((1, 3), jnp.float32),          # [total, det, cons]
        ),
        in_specs=[_VMEM] * 5,
        out_specs=(_VMEM, _SMEM),
        cost_estimate=pl.CostEstimate(flops=_CONV_FLOPS, transcendentals=0,
                                      bytes_accessed=bytes_accessed),
    )(xpad2d, wbd, b_dense, tgt_dense, pre_dense)


def _fwd_only_call(xpad2d, wbd, b_dense):
    bytes_accessed = 4 * (xpad2d.size + wbd.size + b_dense.size + ROWS * LANES)
    return pl.pallas_call(
        fwd_only_kernel,
        out_shape=jax.ShapeDtypeStruct((ROWS, LANES), jnp.float32),
        in_specs=[_VMEM] * 3,
        out_specs=_VMEM,
        cost_estimate=pl.CostEstimate(flops=_CONV_FLOPS, transcendentals=0,
                                      bytes_accessed=bytes_accessed),
    )(xpad2d, wbd, b_dense)


# ---------------------------------------------------------------------------
# Parameter preparation — runs ONCE per weight update, NOT in the per-step path.
# ---------------------------------------------------------------------------
def prepare_params(params):
    w, b = params["w"], params["b"]                         # (3,3,C_IN,C_OUT), (1,C_OUT)
    wmat = w.reshape(KH * KW, C_IN, C_OUT)
    eye_w = jnp.eye(W, dtype=w.dtype)
    # per-tap block-diagonal over W so the GEMM output index is (w, c_out): 128 dense lanes
    blocks = [jnp.kron(eye_w, wmat[t]) for t in range(KH * KW)]   # each (64, 128)
    wbd = jnp.concatenate(blocks, axis=0)                   # (576, 128), row=(kh,kw,w,cin)
    b_dense = jnp.tile(b.reshape(1, C_OUT), (1, W))         # (1, 128)
    return {"wbd": wbd, "b_dense": b_dense}


# ---------------------------------------------------------------------------
# JAX glue: layout plumbing only (transpose / pad / contiguous reshapes).
# ---------------------------------------------------------------------------
def _prep_input(x_nchw):
    x = jnp.transpose(x_nchw, (0, 2, 3, 1))                 # NCHW -> NHWC
    xp = jnp.pad(x, ((0, 0), (1, 1), (1, 1), (0, 0)))       # (N, 18, 18, C_IN)
    return xp.reshape(N * HP, WP * C_IN)                    # (36, 72)


@jax.jit
def _train_step(prep, x_nchw, target_nhwc, pre_nhwc):
    xpad2d = _prep_input(x_nchw)
    tgt_dense = target_nhwc.reshape(ROWS, LANES)            # free contiguous reshape
    pre_dense = pre_nhwc.reshape(ROWS, LANES)
    head_dense, losses = _fwd_loss_call(xpad2d, prep["wbd"], prep["b_dense"],
                                        tgt_dense, pre_dense)
    head = head_dense.reshape(N, H, W, C_OUT)
    return head, losses[0, 0], losses[0, 1], losses[0, 2]


@jax.jit
def _forward_only(prep, x_nchw):
    xpad2d = _prep_input(x_nchw)
    head_dense = _fwd_only_call(xpad2d, prep["wbd"], prep["b_dense"])
    return head_dense.reshape(N, H, W, C_OUT)


# ---------------------------------------------------------------------------
# Module equivalents
# ---------------------------------------------------------------------------
def model_forward(prepared_params, x_nchw):
    # `model(batch['input'])` equivalent — lean forward-only path (no loss work).
    return [_forward_only(prepared_params, x_nchw)]         # outputs[-1] is the head


def model_with_loss_pre_forward(prepared_params, batch, pre_batch, pre_output):
    # mirrors ModleWithLossPre.forward(batch, pre_batch, pre_output)
    head, loss, det_loss, cons_loss = _train_step(
        prepared_params, batch["input"], batch["target"], pre_output)
    outputs = [head]
    loss_stats = {"loss": loss, "det_loss": det_loss, "cons_loss": cons_loss}
    # TODO(synk): pre_batch is forwarded for parity with the PyTorch signature;
    # the synthetic loss only consumes pre_output (previous-frame prediction).
    del pre_batch
    return outputs[-1], loss, loss_stats


if __name__ == "__main__":
    key = jax.random.PRNGKey(0)
    k_w, k_b, k_x, k_t, k_px = jax.random.split(key, 5)

    params = {
        "w": jax.random.normal(k_w, (KH, KW, C_IN, C_OUT), jnp.float32) * 0.1,
        "b": jax.random.normal(k_b, (1, C_OUT), jnp.float32) * 0.01,
    }
    # Hoisted weight expansion: once per weight update, outside the step path.
    prep = prepare_params(params)

    batch = {
        "input": jax.random.normal(k_x, (N, C_IN, H, W), jnp.float32),     # NCHW
        "target": jax.random.uniform(k_t, (N, H, W, C_OUT), jnp.float32),  # NHWC
    }
    pre_batch = {
        "input": jax.random.normal(k_px, (N, C_IN, H, W), jnp.float32),    # NCHW
    }
    # previous-frame prediction (as the PyTorch caller would pass it in)
    pre_output = model_forward(prep, pre_batch["input"])[-1]

    out_last, loss, loss_stats = model_with_loss_pre_forward(
        prep, batch, pre_batch, pre_output
    )
    jax.block_until_ready((out_last, loss, loss_stats))

    assert out_last.shape == (N, H, W, C_OUT)
    assert loss.shape == ()
    print("KERNEL_OK")
</pallas_src>

<mosaic_0001>
module attributes {stable_mosaic.version = 11 : i64} {
  func.func @fwd_only_kernel(%arg0: memref<36x72xf32, #tpu.memory_space<vmem>>, %arg1: memref<576x128xf32, #tpu.memory_space<vmem>>, %arg2: memref<1x128xf32, #tpu.memory_space<vmem>>, %arg3: memref<32x128xf32, #tpu.memory_space<vmem>>) attributes {dimension_semantics = [], scalar_prefetch = 0 : i64, scratch_operands = 0 : i64, tpu.core_type = #tpu.core_type<tc>} {
    %c0 = arith.constant 0 : index
    %c0_0 = arith.constant 0 : index
    %0 = vector.load %arg0[%c0, %c0_0] : memref<36x72xf32, #tpu.memory_space<vmem>>, vector<36x72xf32>
    %cst = arith.constant 0.000000e+00 : f32
    %1 = vector.broadcast %cst : f32 to vector<32x128xf32>
    %2 = vector.extract_strided_slice %0 {offsets = [0, 0], sizes = [16, 64], strides = [1, 1]} : vector<36x72xf32> to vector<16x64xf32>
    %3 = vector.extract_strided_slice %0 {offsets = [18, 0], sizes = [16, 64], strides = [1, 1]} : vector<36x72xf32> to vector<16x64xf32>
    %4 = tpu.concatenate %2, %3 in 0 : vector<16x64xf32>, vector<16x64xf32> -> vector<32x64xf32>
    %c0_1 = arith.constant 0 : index
    %c0_2 = arith.constant 0 : index
    %5 = vector.load %arg1[%c0_1, %c0_2] : memref<576x128xf32, #tpu.memory_space<vmem>>, vector<64x128xf32>
    %cst_3 = arith.constant dense<0.000000e+00> : vector<32x128xf32>
    %6 = tpu.matmul %4, %5, %cst_3 {dimension_numbers = #tpu.dot_dimension_numbers<[1], [0], [0], [1], [0, 0, 1, 1], [], []>} : vector<32x64xf32>, vector<64x128xf32>, vector<32x128xf32> -> vector<32x128xf32>
    %7 = arith.addf %1, %6 : vector<32x128xf32>
    %8 = vector.extract_strided_slice %0 {offsets = [0, 4], sizes = [16, 64], strides = [1, 1]} : vector<36x72xf32> to vector<16x64xf32>
    %9 = vector.extract_strided_slice %0 {offsets = [18, 4], sizes = [16, 64], strides = [1, 1]} : vector<36x72xf32> to vector<16x64xf32>
    %10 = tpu.concatenate %8, %9 in 0 : vector<16x64xf32>, vector<16x64xf32> -> vector<32x64xf32>
    %c64 = arith.constant 64 : index
    %c0_4 = arith.constant 0 : index
    %11 = vector.load %arg1[%c64, %c0_4] : memref<576x128xf32, #tpu.memory_space<vmem>>, vector<64x128xf32>
    %cst_5 = arith.constant dense<0.000000e+00> : vector<32x128xf32>
    %12 = tpu.matmul %10, %11, %cst_5 {dimension_numbers = #tpu.dot_dimension_numbers<[1], [0], [0], [1], [0, 0, 1, 1], [], []>} : vector<32x64xf32>, vector<64x128xf32>, vector<32x128xf32> -> vector<32x128xf32>
    %13 = arith.addf %7, %12 : vector<32x128xf32>
    %14 = vector.extract_strided_slice %0 {offsets = [0, 8], sizes = [16, 64], strides = [1, 1]} : vector<36x72xf32> to vector<16x64xf32>
    %15 = vector.extract_strided_slice %0 {offsets = [18, 8], sizes = [16, 64], strides = [1, 1]} : vector<36x72xf32> to vector<16x64xf32>
    %16 = tpu.concatenate %14, %15 in 0 : vector<16x64xf32>, vector<16x64xf32> -> vector<32x64xf32>
    %c128 = arith.constant 128 : index
    %c0_6 = arith.constant 0 : index
    %17 = vector.load %arg1[%c128, %c0_6] : memref<576x128xf32, #tpu.memory_space<vmem>>, vector<64x128xf32>
    %cst_7 = arith.constant dense<0.000000e+00> : vector<32x128xf32>
    %18 = tpu.matmul %16, %17, %cst_7 {dimension_numbers = #tpu.dot_dimension_numbers<[1], [0], [0], [1], [0, 0, 1, 1], [], []>} : vector<32x64xf32>, vector<64x128xf32>, vector<32x128xf32> -> vector<32x128xf32>
    %19 = arith.addf %13, %18 : vector<32x128xf32>
    %20 = vector.extract_strided_slice %0 {offsets = [1, 0], sizes = [16, 64], strides = [1, 1]} : vector<36x72xf32> to vector<16x64xf32>
    %21 = vector.extract_strided_slice %0 {offsets = [19, 0], sizes = [16, 64], strides = [1, 1]} : vector<36x72xf32> to vector<16x64xf32>
    %22 = tpu.concatenate %20, %21 in 0 : vector<16x64xf32>, vector<16x64xf32> -> vector<32x64xf32>
    %c192 = arith.constant 192 : index
    %c0_8 = arith.constant 0 : index
    %23 = vector.load %arg1[%c192, %c0_8] : memref<576x128xf32, #tpu.memory_space<vmem>>, vector<64x128xf32>
    %cst_9 = arith.constant dense<0.000000e+00> : vector<32x128xf32>
    %24 = tpu.matmul %22, %23, %cst_9 {dimension_numbers = #tpu.dot_dimension_numbers<[1], [0], [0], [1], [0, 0, 1, 1], [], []>} : vector<32x64xf32>, vector<64x128xf32>, vector<32x128xf32> -> vector<32x128xf32>
    %25 = arith.addf %19, %24 : vector<32x128xf32>
    %26 = vector.extract_strided_slice %0 {offsets = [1, 4], sizes = [16, 64], strides = [1, 1]} : vector<36x72xf32> to vector<16x64xf32>
    %27 = vector.extract_strided_slice %0 {offsets = [19, 4], sizes = [16, 64], strides = [1, 1]} : vector<36x72xf32> to vector<16x64xf32>
    %28 = tpu.concatenate %26, %27 in 0 : vector<16x64xf32>, vector<16x64xf32> -> vector<32x64xf32>
    %c256 = arith.constant 256 : index
    %c0_10 = arith.constant 0 : index
    %29 = vector.load %arg1[%c256, %c0_10] : memref<576x128xf32, #tpu.memory_space<vmem>>, vector<64x128xf32>
    %cst_11 = arith.constant dense<0.000000e+00> : vector<32x128xf32>
    %30 = tpu.matmul %28, %29, %cst_11 {dimension_numbers = #tpu.dot_dimension_numbers<[1], [0], [0], [1], [0, 0, 1, 1], [], []>} : vector<32x64xf32>, vector<64x128xf32>, vector<32x128xf32> -> vector<32x128xf32>
    %31 = arith.addf %25, %30 : vector<32x128xf32>
    %32 = vector.extract_strided_slice %0 {offsets = [1, 8], sizes = [16, 64], strides = [1, 1]} : vector<36x72xf32> to vector<16x64xf32>
    %33 = vector.extract_strided_slice %0 {offsets = [19, 8], sizes = [16, 64], strides = [1, 1]} : vector<36x72xf32> to vector<16x64xf32>
    %34 = tpu.concatenate %32, %33 in 0 : vector<16x64xf32>, vector<16x64xf32> -> vector<32x64xf32>
    %c320 = arith.constant 320 : index
    %c0_12 = arith.constant 0 : index
    %35 = vector.load %arg1[%c320, %c0_12] : memref<576x128xf32, #tpu.memory_space<vmem>>, vector<64x128xf32>
    %cst_13 = arith.constant dense<0.000000e+00> : vector<32x128xf32>
    %36 = tpu.matmul %34, %35, %cst_13 {dimension_numbers = #tpu.dot_dimension_numbers<[1], [0], [0], [1], [0, 0, 1, 1], [], []>} : vector<32x64xf32>, vector<64x128xf32>, vector<32x128xf32> -> vector<32x128xf32>
    %37 = arith.addf %31, %36 : vector<32x128xf32>
    %38 = vector.extract_strided_slice %0 {offsets = [2, 0], sizes = [16, 64], strides = [1, 1]} : vector<36x72xf32> to vector<16x64xf32>
    %39 = vector.extract_strided_slice %0 {offsets = [20, 0], sizes = [16, 64], strides = [1, 1]} : vector<36x72xf32> to vector<16x64xf32>
    %40 = tpu.concatenate %38, %39 in 0 : vector<16x64xf32>, vector<16x64xf32> -> vector<32x64xf32>
    %c384 = arith.constant 384 : index
    %c0_14 = arith.constant 0 : index
    %41 = vector.load %arg1[%c384, %c0_14] : memref<576x128xf32, #tpu.memory_space<vmem>>, vector<64x128xf32>
    %cst_15 = arith.constant dense<0.000000e+00> : vector<32x128xf32>
    %42 = tpu.matmul %40, %41, %cst_15 {dimension_numbers = #tpu.dot_dimension_numbers<[1], [0], [0], [1], [0, 0, 1, 1], [], []>} : vector<32x64xf32>, vector<64x128xf32>, vector<32x128xf32> -> vector<32x128xf32>
    %43 = arith.addf %37, %42 : vector<32x128xf32>
    %44 = vector.extract_strided_slice %0 {offsets = [2, 4], sizes = [16, 64], strides = [1, 1]} : vector<36x72xf32> to vector<16x64xf32>
    %45 = vector.extract_strided_slice %0 {offsets = [20, 4], sizes = [16, 64], strides = [1, 1]} : vector<36x72xf32> to vector<16x64xf32>
    %46 = tpu.concatenate %44, %45 in 0 : vector<16x64xf32>, vector<16x64xf32> -> vector<32x64xf32>
    %c448 = arith.constant 448 : index
    %c0_16 = arith.constant 0 : index
    %47 = vector.load %arg1[%c448, %c0_16] : memref<576x128xf32, #tpu.memory_space<vmem>>, vector<64x128xf32>
    %cst_17 = arith.constant dense<0.000000e+00> : vector<32x128xf32>
    %48 = tpu.matmul %46, %47, %cst_17 {dimension_numbers = #tpu.dot_dimension_numbers<[1], [0], [0], [1], [0, 0, 1, 1], [], []>} : vector<32x64xf32>, vector<64x128xf32>, vector<32x128xf32> -> vector<32x128xf32>
    %49 = arith.addf %43, %48 : vector<32x128xf32>
    %50 = vector.extract_strided_slice %0 {offsets = [2, 8], sizes = [16, 64], strides = [1, 1]} : vector<36x72xf32> to vector<16x64xf32>
    %51 = vector.extract_strided_slice %0 {offsets = [20, 8], sizes = [16, 64], strides = [1, 1]} : vector<36x72xf32> to vector<16x64xf32>
    %52 = tpu.concatenate %50, %51 in 0 : vector<16x64xf32>, vector<16x64xf32> -> vector<32x64xf32>
    %c512 = arith.constant 512 : index
    %c0_18 = arith.constant 0 : index
    %53 = vector.load %arg1[%c512, %c0_18] : memref<576x128xf32, #tpu.memory_space<vmem>>, vector<64x128xf32>
    %cst_19 = arith.constant dense<0.000000e+00> : vector<32x128xf32>
    %54 = tpu.matmul %52, %53, %cst_19 {dimension_numbers = #tpu.dot_dimension_numbers<[1], [0], [0], [1], [0, 0, 1, 1], [], []>} : vector<32x64xf32>, vector<64x128xf32>, vector<32x128xf32> -> vector<32x128xf32>
    %55 = arith.addf %49, %54 : vector<32x128xf32>
    %c0_20 = arith.constant 0 : index
    %c0_21 = arith.constant 0 : index
    %56 = vector.load %arg2[%c0_20, %c0_21] : memref<1x128xf32, #tpu.memory_space<vmem>>, vector<1x128xf32>
    %57 = vector.broadcast %56 : vector<1x128xf32> to vector<32x128xf32>
    %58 = arith.addf %55, %57 : vector<32x128xf32>
    %cst_22 = arith.constant 0.000000e+00 : f32
    %59 = vector.broadcast %cst_22 : f32 to vector<32x128xf32>
    %60 = arith.maximumf %58, %59 : vector<32x128xf32>
    %c0_23 = arith.constant 0 : index
    %c0_24 = arith.constant 0 : index
    %61 = vector.load %arg3[%c0_23, %c0_24] : memref<32x128xf32, #tpu.memory_space<vmem>>, vector<32x128xf32>
    tpu.vector_store %arg3[%c0_23, %c0_24], %60 {strides = array<i32>} : memref<32x128xf32, #tpu.memory_space<vmem>>, vector<32x128xf32>,
    return
  }
}

</mosaic_0001>

<bundles_post_ra>
// kernel: _forward_only.1
= control target key start
LH: loop header
LB: loop body
LE: loop exit
PB: predicated region body
PF: predicated region fallthrough
CT: control target
= control target key end

     0   :  { %vm54_vm0 = vcmask 523264   ;;  %s1422_s16 = smov 124   ;;  %vm22_vm1 = vcmask 1045504   ;;  %s1423_s9 = smov 120   ;;  %vm354_vm2 = vcmask 1046528   ;;  %vm360_vm3 = vcmask 1044480   ;;  %s1836_s0 = inlined_call_operand.vmem [shape: f32[36,72], index: 0, kind: input, shape index: {}]   ;;  %s1837_s1 = inlined_call_operand.vmem [shape: f32[576,128], index: 1, kind: input, shape index: {}]   ;;  %s1838_s2 = inlined_call_operand.vmem [shape: f32[1,128], index: 2, kind: input, shape index: {}]   ;;  %s1839_s3 = inlined_call_operand.vmem [shape: f32[32,128], index: 3, kind: output, shape index: {}]  }
   0x1   :  { %v1447_v0 = vld [vmem:[%s1836_s0] sm:$0xff]  ;;  %v1452_v1 = vld [vmem:[%s1836_s0 + $0x10] sm:$0xff]  ;;  %v1459_v2 = vld [vmem:[%s1836_s0 + $0x18] sm:$0xff]  ;;  %vm701_vm4 = vcmask 1043456  }
   0x2   :  { %46 = vrot.lane.b32.xlu0 %v1447_v0, %s1422_s16  ;;  %v23_v3 = vrot.slane %v1452_v1, 2  ;;  %v1465_v4 = vld [vmem:[%s1836_s0 + $0x20] sm:$0xf]  ;;  %1244 = vmatprep.mubr.msk.f32.mxu1 %vm54_vm0, %v1447_v0  ;;  %v1472_v5 = vld [vmem:[%s1836_s0 + $0x8] sm:$0xff]  ;;  %v24_v6 = vrot.slane %v1459_v2, 2  ;;  %v35_v8 = vld [vmem:[%s1837_s1 + $0x38] sm:$0xff] }
   0x3   :  { %v26_v7 = vrot.slane %v1465_v4, 2  ;;  %1228 = vmatprep.subr.mxu1 %v35_v8  ;;  %v34_v9 = vld [vmem:[%s1837_s1 + $0x30] sm:$0xff]  ;;  %v43_v10 = vld [vmem:[%s1837_s1 + $0x78] sm:$0xff]  ;;  %v33_v13 = vld [vmem:[%s1837_s1 + $0x28] sm:$0xff]  ;;  %v355_v19 = vrot.slane %v1447_v0, 1  ;;  %v356_v20 = vrot.slane %v1472_v5, 1 }
   0x4   :  { %v1488_v11 = vsel %vm22_vm1, %v23_v3, %v24_v6  ;;  %1229 = vmatpush3.msra.mxu1 %v35_v8  ;;  %1206 = vmatprep.subr.mxu0 %v43_v10  ;;  %v42_v12 = vld [vmem:[%s1837_s1 + $0x70] sm:$0xff]  ;;  %v41_v15 = vld [vmem:[%s1837_s1 + $0x68] sm:$0xff]  ;;  %v32_v16 = vld [vmem:[%s1837_s1 + $0x20] sm:$0xff]  ;;  %v358_v25 = vrot.slane %v1452_v1, 1  ;;  %v361_v28 = vrot.slane %v1452_v1, 3  ;;  %v362_v29 = vrot.slane %v1459_v2, 3 }
   0x5   :  { %50 = vrot.lane.b32.xlu1 %v1488_v11, %s1422_s16  ;;  %v1501_v14 = vsel %vm22_vm1, %v24_v6, %v26_v7  ;;  %1230 = vmatprep.subr.mxu1 %v34_v9  ;;  %v40_v17 = vld [vmem:[%s1837_s1 + $0x60] sm:$0xff]  ;;  %v31_v18 = vld [vmem:[%s1837_s1 + $0x18] sm:$0xff]  ;;  %v30_v22 = vld [vmem:[%s1837_s1 + $0x10] sm:$0xff]  ;;  %v357_v24 = vsel %vm354_vm2, %v355_v19, %v356_v20  ;;  %v364_v35 = vrot.slane %v1465_v4, 3  ;;  %v697_v39 = vrot.slane %v1447_v0, 2 }
   0x6   :  { %48 = vrot.lane.b32.xlu0 %v1472_v5, %s1422_s16  ;;  %1207 = vmatpush3.msra.mxu0 %v43_v10  ;;  %v39_v21 = vld [vmem:[%s1837_s1 + $0x58] sm:$0xff]  ;;  %v38_v23 = vld [vmem:[%s1837_s1 + $0x50] sm:$0xff]  ;;  %v29_v26 = vld [vmem:[%s1837_s1 + $0x8] sm:$0xff]  ;;  %v1551_v31 = vsel %vm354_vm2, %v356_v20, %v358_v25  ;;  %v1563_v34 = vsel %vm360_vm3, %v361_v28, %v362_v29  ;;  %v698_v40 = vrot.slane %v1472_v5, 2  ;;  %v702_v44 = vrot.slane %v1452_v1, 4 }
   0x7   :  { %1231 = vmatpush3.msra.mxu1 %v34_v9  ;;  %1208 = vmatprep.subr.mxu0 %v42_v12  ;;  %v37_v27 = vld [vmem:[%s1837_s1 + $0x48] sm:$0xff]  ;;  %v28_v30 = vld [vmem:[%s1837_s1] sm:$0xff]  ;;  %v373_v33 = vld [vmem:[%s1837_s1 + $0xf8] sm:$0xff]  ;;  %v365_v38 = vsel %vm360_vm3, %v362_v29, %v364_v35  ;;  %v703_v45 = vrot.slane %v1459_v2, 4  ;;  %v705_v48 = vrot.slane %v1465_v4, 4 }
   0x8   :  { %1232 = vmatprep.subr.mxu1 %v33_v13  ;;  %1209 = vmatpush3.msra.mxu0 %v42_v12  ;;  %v36_v32 = vld [vmem:[%s1837_s1 + $0x40] sm:$0xff]  ;;  %v372_v36 = vld [vmem:[%s1837_s1 + $0xf0] sm:$0xff]  ;;  %v1574_v37 = vld [vmem:[%s1837_s1 + $0xb8] sm:$0xff]  ;;  %v1596_v43 = vsel %vm22_vm1, %v697_v39, %v698_v40  ;;  %v1612_v47 = vsel %vm22_vm1, %v698_v40, %v23_v3 }
   0x9   :  { %52 = vrot.lane.b32.xlu1 %v1501_v14, %s1422_s16  ;;  %1233 = vmatpush3.msra.mxu1 %v33_v13  ;;  %v371_v41 = vld [vmem:[%s1837_s1 + $0xe8] sm:$0xff]  ;;  %v370_v42 = vld [vmem:[%s1837_s1 + $0xe0] sm:$0xff]  ;;  %v369_v46 = vld [vmem:[%s1837_s1 + $0xd8] sm:$0xff]  ;;  %v1615_v49 = vsel %vm701_vm4, %v702_v44, %v703_v45  ;;  %v1627_v52 = vsel %vm701_vm4, %v703_v45, %v705_v48 }
   0xa   :  { %249 = vrot.lane.b32.xlu0 %v1447_v0, %s1423_s9  ;;  %1210 = vmatprep.subr.mxu0 %v41_v15  ;;  %v368_v50 = vld [vmem:[%s1837_s1 + $0xd0] sm:$0xff]  ;;  %v367_v51 = vld [vmem:[%s1837_s1 + $0xc8] sm:$0xff]  ;;  %v366_v53 = vld [vmem:[%s1837_s1 + $0xc0] sm:$0xff] }
   0xb   :  { %1234 = vmatprep.subr.mxu1 %v32_v16  ;;  %1211 = vmatpush3.msra.mxu0 %v41_v15  ;;  %v591_v54 = vld [vmem:[%s1837_s1 + $0x178] sm:$0xff]  ;;  %v590_v55 = vld [vmem:[%s1837_s1 + $0x170] sm:$0xff]  ;;  %v589_v56 = vld [vmem:[%s1837_s1 + $0x168] sm:$0xff] }
   0xc   :  { %1235 = vmatpush3.msra.mxu1 %v32_v16  ;;  %1212 = vmatprep.subr.mxu0 %v40_v17  ;;  %v588_v57 = vld [vmem:[%s1837_s1 + $0x160] sm:$0xff]  ;;  %v587_v58 = vld [vmem:[%s1837_s1 + $0x158] sm:$0xff]  ;;  %v586_v59 = vld [vmem:[%s1837_s1 + $0x150] sm:$0xff] }
   0xd   :  { %251 = vrot.lane.b32.xlu1 %v1472_v5, %s1423_s9  ;;  %1236 = vmatprep.subr.mxu1 %v31_v18  ;;  %v585_v60 = vld [vmem:[%s1837_s1 + $0x148] sm:$0xff]  ;;  %v584_v61 = vld [vmem:[%s1837_s1 + $0x140] sm:$0xff]  ;;  %v819_v62 = vld [vmem:[%s1837_s1 + $0x1f8] sm:$0xff] }
   0xe   :  { %253 = vrot.lane.b32.xlu0 %v1488_v11, %s1423_s9  ;;  %1213 = vmatpush3.msra.mxu0 %v40_v17  ;;  %v247_v1 = vld [vmem:[%s1837_s1 + $0xb0] sm:$0xff]  ;;  %v246_v3 = vld [vmem:[%s1837_s1 + $0xa8] sm:$0xff]  ;;  %v245_v4 = vld [vmem:[%s1837_s1 + $0xa0] sm:$0xff] }
   0xf   :  { %1237 = vmatpush3.msra.mxu1 %v31_v18  ;;  %1214 = vmatprep.subr.mxu0 %v39_v21  ;;  %v244_v7 = vld [vmem:[%s1837_s1 + $0x98] sm:$0xff]  ;;  %v243_v8 = vld [vmem:[%s1837_s1 + $0x90] sm:$0xff]  ;;  %v242_v10 = vld [vmem:[%s1837_s1 + $0x88] sm:$0xff] }
  0x10   :  { %1238 = vmatprep.subr.mxu1 %v30_v22  ;;  %1215 = vmatpush3.msra.mxu0 %v39_v21  ;;  %v241_v12 = vld [vmem:[%s1837_s1 + $0x80] sm:$0xff]  ;;  %v477_v15 = vld [vmem:[%s1837_s1 + $0x130] sm:$0xff]  ;;  %v476_v18 = vld [vmem:[%s1837_s1 + $0x128] sm:$0xff] }
  0x11   :  { %255 = vrot.lane.b32.xlu1 %v1501_v14, %s1423_s9  ;;  %1239 = vmatpush3.msra.mxu1 %v30_v22  ;;  %v475_v19 = vld [vmem:[%s1837_s1 + $0x120] sm:$0xff]  ;;  %v818_v21 = vld [vmem:[%s1837_s1 + $0x1f0] sm:$0xff]  ;;  %v474_v22 = vld [vmem:[%s1837_s1 + $0x118] sm:$0xff] }
  0x12   :  { %479 = vrot.lane.b32.xlu0 %v357_v24, %s1422_s16  ;;  %1216 = vmatprep.subr.mxu0 %v38_v23  ;;  %v473_v25 = vld [vmem:[%s1837_s1 + $0x110] sm:$0xff]  ;;  %v471_v28 = vld [vmem:[%s1837_s1 + $0x100] sm:$0xff]  ;;  %v932_v44 = vld [vmem:[%s1837_s1 + $0x238] sm:$0xff] }
  0x13   :  { %1240 = vmatprep.subr.mxu1 %v29_v26  ;;  %1217 = vmatpush3.msra.mxu0 %v38_v23  ;;  %v711_v39 = vld [vmem:[%s1837_s1 + $0x1a0] sm:$0xff]  ;;  %v931_v48 = vld [vmem:[%s1837_s1 + $0x230] sm:$0xff] }
  0x14   :  { %1241 = vmatpush3.msra.mxu1 %v29_v26  ;;  %1218 = vmatprep.subr.mxu0 %v37_v27  ;;  %v472_v26 = vld [vmem:[%s1837_s1 + $0x108] sm:$0xff]  ;;  %v812_v40 = vld [vmem:[%s1837_s1 + $0x1c0] sm:$0xff] }
  0x15   :  { %592 = vrot.lane.b32.xlu1 %v357_v24, %s1423_s9  ;;  %1242 = vmatprep.subr.mxu1 %v28_v30 }
  0x16   :  { %481 = vrot.lane.b32.xlu0 %v1551_v31, %s1422_s16  ;;  %1219 = vmatpush3.msra.mxu0 %v37_v27  ;;  %v816_v27 = vld [vmem:[%s1837_s1 + $0x1e0] sm:$0xff] }
  0x17   :  { %1243 = vmatpush3.msra.mxu1 %v28_v30  ;;  %1220 = vmatprep.subr.mxu0 %v36_v32  ;;  %v815_v30 = vld [vmem:[%s1837_s1 + $0x1d8] sm:$0xff] }
  0x18   :  { %1272 = vmatprep.subr.mxu1 %v373_v33  ;;  %1245 = vmatmul.mubr.msk.f32.vlgmr.msra.gmra.mxu1 %vm54_vm0, %v1472_v5 }
  0x19   :  { %594 = vrot.lane.b32.xlu1 %v1551_v31, %s1423_s9  ;;  %1273 = vmatpush3.msra.mxu1 %v373_v33  ;;  %v814_v33 = vld [vmem:[%s1837_s1 + $0x1d0] sm:$0xff] }
  0x1a   :  { %483 = vrot.lane.b32.xlu0 %v1563_v34, %s1422_s16  ;;  %1221 = vmatpush3.msra.mxu0 %v36_v32  ;;  %v714_v32 = vld [vmem:[%s1837_s1 + $0x1b8] sm:$0xff] }
  0x1b   :  { %1274 = vmatprep.subr.mxu1 %v372_v36  ;;  %1250 = vmatprep.subr.mxu0 %v1574_v37 }
  0x1c   :  { %1275 = vmatpush3.msra.mxu1 %v372_v36  ;;  %1247 = vmatprep.mubr.msk.f32.mxu1 %vm54_vm0, %v1488_v11 }
  0x1d   :  { %596 = vrot.lane.b32.xlu1 %v1563_v34, %s1423_s9  ;;  %1276 = vmatprep.subr.mxu1 %v371_v41 }
  0x1e   :  { %485 = vrot.lane.b32.xlu0 %v365_v38, %s1422_s16  ;;  %1248 = vmatmul.mubr.msk.f32.gmra.mxu1 %vm54_vm0, %v1501_v14  ;;  %v478_v14 = vld [vmem:[%s1837_s1 + $0x138] sm:$0xff] }
  0x1f   :  { %1277 = vmatpush3.msra.mxu1 %v371_v41  ;;  %1288 = vmatprep.mubr.msk.f32.mxu1 %vm54_vm0, %v357_v24  ;;  %v817_v24 = vld [vmem:[%s1837_s1 + $0x1e8] sm:$0xff]  ;;  %v710_v41 = vld [vmem:[%s1837_s1 + $0x198] sm:$0xff] }
  0x20   :  { %1278 = vmatprep.subr.mxu1 %v370_v42 }
  0x21   :  { %598 = vrot.lane.b32.xlu1 %v365_v38, %s1423_s9  ;;  %1279 = vmatpush3.msra.mxu1 %v370_v42 }
  0x22   :  { %820 = vrot.lane.b32.xlu0 %v1596_v43, %s1422_s16  ;;  %1280 = vmatprep.subr.mxu1 %v369_v46 }
  0x23   :  { %1281 = vmatpush3.msra.mxu1 %v369_v46  ;;  %v709_v46 = vld [vmem:[%s1837_s1 + $0x190] sm:$0xff] }
  0x24   :  { %1282 = vmatprep.subr.mxu1 %v368_v50 }
  0x25   :  { %822 = vrot.lane.b32.xlu1 %v1612_v47, %s1422_s16  ;;  %1283 = vmatpush3.msra.mxu1 %v368_v50  ;;  %v708_v50 = vld [vmem:[%s1837_s1 + $0x188] sm:$0xff] }
  0x26   :  { %824 = vrot.lane.b32.xlu0 %v1615_v49, %s1422_s16  ;;  %1284 = vmatprep.subr.mxu1 %v367_v51 }
  0x27   :  { %1285 = vmatpush3.msra.mxu1 %v367_v51  ;;  %v930_v51 = vld [vmem:[%s1837_s1 + $0x228] sm:$0xff] }
  0x28   :  { %1286 = vmatprep.subr.mxu1 %v366_v53 }
  0x29   :  { %826 = vrot.lane.b32.xlu1 %v1627_v52, %s1422_s16  ;;  %1287 = vmatpush3.msra.mxu1 %v366_v53  ;;  %v707_v53 = vld [vmem:[%s1837_s1 + $0x180] sm:$0xff] }
  0x2a   :  { %933 = vrot.lane.b32.xlu0 %v1596_v43, %s1423_s9  ;;  %1316 = vmatprep.subr.mxu1 %v591_v54 }
  0x2b   :  { %1289 = vmatmul.mubr.msk.f32.vlgmr.msra.gmra.mxu1 %vm54_vm0, %v1551_v31 }
  0x2c   :  { %1317 = vmatpush3.msra.mxu1 %v591_v54  ;;  %1291 = vmatprep.mubr.msk.f32.mxu1 %vm54_vm0, %v1563_v34  ;;  %v713_v34 = vld [vmem:[%s1837_s1 + $0x1b0] sm:$0xff]  ;;  %v929_v54 = vld [vmem:[%s1837_s1 + $0x220] sm:$0xff] }
  0x2d   :  { %937 = vrot.lane.b32.xlu1 %v1615_v49, %s1423_s9  ;;  %1318 = vmatprep.subr.mxu1 %v590_v55 }
  0x2e   :  { %935 = vrot.lane.b32.xlu0 %v1612_v47, %s1423_s9  ;;  %1319 = vmatpush3.msra.mxu1 %v590_v55 }
  0x2f   :  { %1320 = vmatprep.subr.mxu1 %v589_v56  ;;  %1292 = vmatmul.mubr.msk.f32.gmra.mxu1 %vm54_vm0, %v365_v38  ;;  %v813_v38 = vld [vmem:[%s1837_s1 + $0x1c8] sm:$0xff] }
  0x30   :  { %1321 = vmatpush3.msra.mxu1 %v589_v56  ;;  %v928_v56 = vld [vmem:[%s1837_s1 + $0x218] sm:$0xff] }
  0x31   :  { %939 = vrot.lane.b32.xlu1 %v1627_v52, %s1423_s9  ;;  %1322 = vmatprep.subr.mxu1 %v588_v57 }
  0x32   :  { %1323 = vmatpush3.msra.mxu1 %v588_v57  ;;  %v927_v57 = vld [vmem:[%s1837_s1 + $0x210] sm:$0xff] }
  0x33   :  { %1324 = vmatprep.subr.mxu1 %v587_v58 }
  0x34   :  { %1325 = vmatpush3.msra.mxu1 %v587_v58 }
  0x35   :  { %1326 = vmatprep.subr.mxu1 %v586_v59 }
  0x36   :  { %1327 = vmatpush3.msra.mxu1 %v586_v59 }
  0x37   :  { %1328 = vmatprep.subr.mxu1 %v585_v60 }
  0x38   :  { %1329 = vmatpush3.msra.mxu1 %v585_v60 }
  0x39   :  { %1330 = vmatprep.subr.mxu1 %v584_v61 }
  0x3a   :  { %1331 = vmatpush3.msra.mxu1 %v584_v61 }
  0x3b   :  { %1360 = vmatprep.subr.mxu1 %v819_v62 }
  0x74   :  { %v47_v63 = vpop.permute.xlu0 %46 }
  0x75   :  { %1222 = vmatprep.mubr.msk.f32.mxu0 %vm54_vm0, %v47_v63 }
  0x77   :  { %v51_v2 = vpop.permute.xlu1 %50 }
  0x78   :  { %v49_v0 = vpop.permute.xlu0 %48 }
  0x79   :  { %1223 = vmatmul.mubr.msk.f32.vlgmr.msra.gmra.mxu0 %vm54_vm0, %v49_v0 }
  0x7a   :  { %1251 = vmatpush3.msra.mxu0 %v1574_v37  ;;  %1225 = vmatprep.mubr.msk.f32.mxu0 %vm54_vm0, %v51_v2  ;;  %v712_v37 = vld [vmem:[%s1837_s1 + $0x1a8] sm:$0xff] }
  0x7b   :  { %1252 = vmatprep.subr.mxu0 %v247_v1  ;;  %v53_v5 = vpop.permute.xlu1 %52 }
  0x7c   :  { %1253 = vmatpush3.msra.mxu0 %v247_v1  ;;  %v250_v6 = vpop.permute.xlu0 %249 }
  0x7d   :  { %1254 = vmatprep.subr.mxu0 %v246_v3  ;;  %1226 = vmatmul.mubr.msk.f32.gmra.mxu0 %vm54_vm0, %v53_v5 }
  0x7e   :  { %1255 = vmatpush3.msra.mxu0 %v246_v3  ;;  %1266 = vmatprep.mubr.msk.f32.mxu0 %vm54_vm0, %v250_v6 }
  0x7f   :  { %1256 = vmatprep.subr.mxu0 %v245_v4  ;;  %v252_v9 = vpop.permute.xlu1 %251 }
  0x80   :  { %1257 = vmatpush3.msra.mxu0 %v245_v4  ;;  %v254_v11 = vpop.permute.xlu0 %253 }
  0x81   :  { %1258 = vmatprep.subr.mxu0 %v244_v7 }
  0x82   :  { %1259 = vmatpush3.msra.mxu0 %v244_v7 }
  0x83   :  { %1260 = vmatprep.subr.mxu0 %v243_v8  ;;  %v256_v13 = vpop.permute.xlu1 %255 }
  0x84   :  { %1261 = vmatpush3.msra.mxu0 %v243_v8  ;;  %v480_v17 = vpop.permute.xlu0 %479 }
  0x85   :  { %1262 = vmatprep.subr.mxu0 %v242_v10 }
  0x86   :  { %1263 = vmatpush3.msra.mxu0 %v242_v10 }
  0x87   :  { %1264 = vmatprep.subr.mxu0 %v241_v12  ;;  %v593_v16 = vpop.permute.xlu1 %592 }
  0x88   :  { %1265 = vmatpush3.msra.mxu0 %v241_v12  ;;  %1332 = vmatprep.mubr.msk.f32.mxu1 %vm54_vm0, %v593_v16  ;;  %v482_v23 = vpop.permute.xlu0 %481 }
  0x89   :  { %1267 = vmatmul.mubr.msk.f32.vlgmr.msra.gmra.mxu0 %vm54_vm0, %v252_v9  ;;  %1294 = vmatprep.subr.mxu0 %v478_v14 }
  0x8a   :  { %1295 = vmatpush3.msra.mxu0 %v478_v14  ;;  %1269 = vmatprep.mubr.msk.f32.mxu0 %vm54_vm0, %v254_v11 }
  0x8b   :  { %1296 = vmatprep.subr.mxu0 %v477_v15  ;;  %v595_v20 = vpop.permute.xlu1 %594 }
  0x8c   :  { %1297 = vmatpush3.msra.mxu0 %v477_v15  ;;  %1333 = vmatmul.mubr.msk.f32.vlgmr.msra.gmra.mxu1 %vm54_vm0, %v595_v20  ;;  %v484_v29 = vpop.permute.xlu0 %483 }
  0x8d   :  { %1270 = vmatmul.mubr.msk.f32.gmra.mxu0 %vm54_vm0, %v256_v13  ;;  %1298 = vmatprep.subr.mxu0 %v476_v18 }
  0x8e   :  { %1299 = vmatpush3.msra.mxu0 %v476_v18  ;;  %1361 = vmatpush3.msra.mxu1 %v819_v62 }
  0x8f   :  { %1300 = vmatprep.subr.mxu0 %v475_v19  ;;  %1362 = vmatprep.subr.mxu1 %v818_v21  ;;  %v597_v31 = vpop.permute.xlu1 %596 }
  0x90   :  { %1301 = vmatpush3.msra.mxu0 %v475_v19  ;;  %1363 = vmatpush3.msra.mxu1 %v818_v21  ;;  %v486_v35 = vpop.permute.xlu0 %485 }
  0x91   :  { %1302 = vmatprep.subr.mxu0 %v474_v22  ;;  %1364 = vmatprep.subr.mxu1 %v817_v24 }
  0x92   :  { %1303 = vmatpush3.msra.mxu0 %v474_v22  ;;  %1310 = vmatprep.mubr.msk.f32.mxu0 %vm54_vm0, %v480_v17 }
  0x93   :  { %1304 = vmatprep.subr.mxu0 %v473_v25  ;;  %1365 = vmatpush3.msra.mxu1 %v817_v24  ;;  %v599_v36 = vpop.permute.xlu1 %598 }
  0x94   :  { %1305 = vmatpush3.msra.mxu0 %v473_v25  ;;  %1366 = vmatprep.subr.mxu1 %v816_v27  ;;  %v821_v42 = vpop.permute.xlu0 %820 }
  0x95   :  { %1306 = vmatprep.subr.mxu0 %v472_v26  ;;  %1367 = vmatpush3.msra.mxu1 %v816_v27 }
  0x96   :  { %1307 = vmatpush3.msra.mxu0 %v472_v26  ;;  %1368 = vmatprep.subr.mxu1 %v815_v30 }
  0x97   :  { %1308 = vmatprep.subr.mxu0 %v471_v28  ;;  %1369 = vmatpush3.msra.mxu1 %v815_v30  ;;  %v823_v45 = vpop.permute.xlu1 %822 }
  0x98   :  { %1309 = vmatpush3.msra.mxu0 %v471_v28  ;;  %1370 = vmatprep.subr.mxu1 %v814_v33  ;;  %v825_v58 = vpop.permute.xlu0 %824 }
  0x99   :  { %1338 = vmatprep.subr.mxu0 %v714_v32  ;;  %1311 = vmatmul.mubr.msk.f32.vlgmr.msra.gmra.mxu0 %vm54_vm0, %v482_v23 }
  0x9a   :  { %1339 = vmatpush3.msra.mxu0 %v714_v32  ;;  %1313 = vmatprep.mubr.msk.f32.mxu0 %vm54_vm0, %v484_v29 }
  0x9b   :  { %1340 = vmatprep.subr.mxu0 %v713_v34  ;;  %1371 = vmatpush3.msra.mxu1 %v814_v33  ;;  %v827_v55 = vpop.permute.xlu1 %826 }
  0x9c   :  { %1341 = vmatpush3.msra.mxu0 %v713_v34  ;;  %1335 = vmatprep.mubr.msk.f32.mxu1 %vm54_vm0, %v597_v31  ;;  %v934_v60 = vpop.permute.xlu0 %933 }
  0x9d   :  { %1314 = vmatmul.mubr.msk.f32.gmra.mxu0 %vm54_vm0, %v486_v35  ;;  %1342 = vmatprep.subr.mxu0 %v712_v37 }
  0x9e   :  { %1372 = vmatprep.subr.mxu1 %v813_v38  ;;  %1336 = vmatmul.mubr.msk.f32.gmra.mxu1 %vm54_vm0, %v599_v36 }
  0x9f   :  { %1343 = vmatpush3.msra.mxu0 %v712_v37  ;;  %1373 = vmatpush3.msra.mxu1 %v813_v38  ;;  %v938_v59 = vpop.permute.xlu1 %937 }
  0xa0   :  { %1344 = vmatprep.subr.mxu0 %v711_v39  ;;  %1374 = vmatprep.subr.mxu1 %v812_v40 }
  0xa1   :  { %1345 = vmatpush3.msra.mxu0 %v711_v39  ;;  %1375 = vmatpush3.msra.mxu1 %v812_v40 }
  0xa2   :  { %1346 = vmatprep.subr.mxu0 %v710_v41  ;;  %1376 = vmatprep.mubr.msk.f32.mxu1 %vm54_vm0, %v821_v42 }
  0xa3   :  { %1404 = vmatprep.subr.mxu1 %v932_v44  ;;  %1347 = vmatpush3.msra.mxu0 %v710_v41 }
  0xa4   :  { %1377 = vmatmul.mubr.msk.f32.vlgmr.msra.gmra.mxu1 %vm54_vm0, %v823_v45  ;;  %1348 = vmatprep.subr.mxu0 %v709_v46 }
  0xa5   :  { %1412 = vmatpush3.msra.mxu1 %v932_v44  ;;  %1349 = vmatpush3.msra.mxu0 %v709_v46 }
  0xa6   :  { %1405 = vmatprep.subr.mxu1 %v931_v48  ;;  %1350 = vmatprep.subr.mxu0 %v708_v50 }
  0xa7   :  { %1413 = vmatpush3.msra.mxu1 %v931_v48  ;;  %1351 = vmatpush3.msra.mxu0 %v708_v50 }
  0xa8   :  { %1406 = vmatprep.subr.mxu1 %v930_v51  ;;  %1352 = vmatprep.subr.mxu0 %v707_v53 }
  0xa9   :  { %1414 = vmatpush3.msra.mxu1 %v930_v51  ;;  %1353 = vmatpush3.msra.mxu0 %v707_v53 }
  0xaa   :  { %1407 = vmatprep.subr.mxu1 %v929_v54  ;;  %1354 = vmatprep.mubr.msk.f32.mxu0 %vm54_vm0, %v1596_v43  ;;  %v926_v43 = vld [vmem:[%s1837_s1 + $0x208] sm:$0xff] }
  0xab   :  { %1415 = vmatpush3.msra.mxu1 %v929_v54  ;;  %1355 = vmatmul.mubr.msk.f32.vlgmr.msra.gmra.mxu0 %vm54_vm0, %v1612_v47  ;;  %v925_v47 = vld [vmem:[%s1837_s1 + $0x200] sm:$0xff] }
  0xac   :  { %1382 = vmatprep.subr.mxu0 %v932_v44  ;;  %1408 = vmatprep.subr.mxu1 %v928_v56 }
  0xad   :  { %1383 = vmatpush3.msra.mxu0 %v932_v44  ;;  %1416 = vmatpush3.msra.mxu1 %v928_v56 }
  0xae   :  { %1384 = vmatprep.subr.mxu0 %v931_v48  ;;  %1409 = vmatprep.subr.mxu1 %v927_v57 }
  0xaf   :  { %1357 = vmatprep.mubr.msk.f32.mxu0 %vm54_vm0, %v1615_v49  ;;  %1379 = vmatprep.mubr.msk.f32.mxu1 %vm54_vm0, %v825_v58  ;;  %v940_v49 = vpop.permute.xlu1 %939 }
  0xb0   :  { %1385 = vmatpush3.msra.mxu0 %v931_v48  ;;  %1417 = vmatpush3.msra.mxu1 %v927_v57 }
  0xb1   :  { %1358 = vmatmul.mubr.msk.f32.gmra.mxu0 %vm54_vm0, %v1627_v52  ;;  %1380 = vmatmul.mubr.msk.f32.gmra.mxu1 %vm54_vm0, %v827_v55  ;;  %v936_v52 = vpop.permute.xlu0 %935 }
  0xb2   :  { %1386 = vmatprep.subr.mxu0 %v930_v51  ;;  %1410 = vmatprep.subr.mxu1 %v926_v43 }
  0xb3   :  { %1387 = vmatpush3.msra.mxu0 %v930_v51  ;;  %1418 = vmatpush3.msra.mxu1 %v926_v43 }
  0xb4   :  { %1388 = vmatprep.subr.mxu0 %v929_v54  ;;  %1411 = vmatprep.subr.mxu1 %v925_v47 }
  0xb5   :  { %1389 = vmatpush3.msra.mxu0 %v929_v54  ;;  %1419 = vmatpush3.msra.mxu1 %v925_v47 }
  0xb6   :  { %1401 = vmatprep.mubr.msk.f32.mxu1 %vm54_vm0, %v938_v59  ;;  %1390 = vmatprep.subr.mxu0 %v928_v56 }
  0xb7   :  { %1402 = vmatmul.mubr.msk.f32.vlgmr.msra.gmra.mxu1 %vm54_vm0, %v940_v49  ;;  %1391 = vmatpush3.msra.mxu0 %v928_v56  ;;  %v1097_v56 = vld [vmem:[%s1838_s2] ss:$0 sm:$0xff] }
  0xb8   :  { %1398 = vmatprep.mubr.msk.f32.mxu0 %vm54_vm0, %v934_v60  ;;  %1392 = vmatprep.subr.mxu0 %v927_v57 }
  0xb9   :  { %1393 = vmatpush3.msra.mxu0 %v927_v57 }
  0xba   :  { %1394 = vmatprep.subr.mxu0 %v926_v43 }
  0xbb   :  { %1395 = vmatpush3.msra.mxu0 %v926_v43 }
  0xbc   :  { %1396 = vmatprep.subr.mxu0 %v925_v47 }
  0xbd   :  { %1397 = vmatpush3.msra.mxu0 %v925_v47 }
  0xbe   :  { %1399 = vmatmul.mubr.msk.f32.vlgmr.msra.gmra.mxu0 %vm54_vm0, %v936_v52 }
  0xd8   :  { %v1246_v62 = vpop.f32.mrf.mxu1 }
  0xda   :  { %v222_v0 = vpop.f32.mrf.mxu1 }
  0xde   :  { %v1249_v2 = vpop.f32.mrf.mxu1 }
  0xe0   :  { %v232_v4 = vpop.f32.mrf.mxu1 }
  0xeb   :  { %v1290_v6 = vpop.f32.mrf.mxu1 }
  0xed   :  { %v448_v8 = vpop.f32.mrf.mxu1 }
  0xef   :  { %v1293_v10 = vpop.f32.mrf.mxu1 }
  0xf1   :  { %v458_v12 = vpop.f32.mrf.mxu1 }
 0x139   :  { %v1224_v61 = vpop.f32.mrf.mxu0 }
 0x13a   :  { %v228_v27 = vadd.f32 %v1246_v62, %v1224_v61 }
 0x13b   :  { %v129_v63 = vpop.f32.mrf.mxu0 }
 0x13c   :  { %v223_v31 = vadd.f32 %v222_v0, %v129_v63 }
 0x13d   :  { %v1227_v1 = vpop.f32.mrf.mxu0 }
 0x13e   :  { %v238_v17 = vadd.f32 %v1249_v2, %v1227_v1 }
 0x13f   :  { %v139_v3 = vpop.f32.mrf.mxu0 }
 0x140   :  { %v233_v19 = vadd.f32 %v232_v4, %v139_v3 }
 0x149   :  { %v1268_v5 = vpop.f32.mrf.mxu0 }
 0x14a   :  { %v351_v32 = vadd.f32 %v1268_v5, %v228_v27 }
 0x14b   :  { %v331_v7 = vpop.f32.mrf.mxu0 }
 0x14c   :  { %v1334_v13 = vpop.f32.mrf.mxu1  ;;  %v350_v36 = vadd.f32 %v331_v7, %v223_v31  ;;  %v468_v39 = vadd.f32 %v1290_v6, %v351_v32 }
 0x14d   :  { %v1271_v9 = vpop.f32.mrf.mxu0 }
 0x14e   :  { %v674_v15 = vpop.f32.mrf.mxu1  ;;  %v353_v20 = vadd.f32 %v1271_v9, %v238_v17  ;;  %v467_v46 = vadd.f32 %v448_v8, %v350_v36 }
 0x14f   :  { %v341_v11 = vpop.f32.mrf.mxu0 }
 0x150   :  { %v352_v22 = vadd.f32 %v341_v11, %v233_v19  ;;  %v470_v24 = vadd.f32 %v1293_v10, %v353_v20 }
 0x152   :  { %v469_v28 = vadd.f32 %v458_v12, %v352_v22 }
 0x159   :  { %v1312_v14 = vpop.f32.mrf.mxu0 }
 0x15a   :  { %v581_v45 = vadd.f32 %v1312_v14, %v468_v39 }
 0x15b   :  { %v561_v16 = vpop.f32.mrf.mxu0 }
 0x15c   :  { %v580_v53 = vadd.f32 %v561_v16, %v467_v46  ;;  %v694_v57 = vadd.f32 %v1334_v13, %v581_v45 }
 0x15d   :  { %v1315_v21 = vpop.f32.mrf.mxu0 }
 0x15e   :  { %v1337_v18 = vpop.f32.mrf.mxu1  ;;  %v583_v29 = vadd.f32 %v1315_v21, %v470_v24  ;;  %v693_v47 = vadd.f32 %v674_v15, %v580_v53 }
 0x15f   :  { %v571_v25 = vpop.f32.mrf.mxu0 }
 0x160   :  { %v684_v23 = vpop.f32.mrf.mxu1  ;;  %v582_v33 = vadd.f32 %v571_v25, %v469_v28  ;;  %v696_v37 = vadd.f32 %v1337_v18, %v583_v29 }
 0x162   :  { %v695_v40 = vadd.f32 %v684_v23, %v582_v33 }
 0x164   :  { %v1378_v26 = vpop.f32.mrf.mxu1 }
 0x166   :  { %v902_v34 = vpop.f32.mrf.mxu1 }
 0x16b   :  { %v1356_v30 = vpop.f32.mrf.mxu0 }
 0x16c   :  { %v809_v43 = vadd.f32 %v1356_v30, %v694_v57 }
 0x16d   :  { %v789_v35 = vpop.f32.mrf.mxu0 }
 0x16e   :  { %v808_v52 = vadd.f32 %v789_v35, %v693_v47  ;;  %v922_v0 = vadd.f32 %v1378_v26, %v809_v43 }
 0x170   :  { %v921_v3 = vadd.f32 %v902_v34, %v808_v52 }
 0x171   :  { %v1359_v38 = vpop.f32.mrf.mxu0  ;;  %v1381_v42 = vpop.f32.mrf.mxu1 }
 0x172   :  { %v811_v41 = vadd.f32 %v1359_v38, %v696_v37 }
 0x173   :  { %v799_v44 = vpop.f32.mrf.mxu0  ;;  %v912_v51 = vpop.f32.mrf.mxu1 }
 0x174   :  { %v924_v48 = vadd.f32 %v1381_v42, %v811_v41  ;;  %v810_v50 = vadd.f32 %v799_v44, %v695_v40 }
 0x176   :  { %v923_v54 = vadd.f32 %v912_v51, %v810_v50 }
 0x177   :  { %v1403_v55 = vpop.f32.mrf.mxu1 }
 0x178   :  { %v1037_v58 = vadd.f32 %v1403_v55, %v924_v48 }
 0x179   :  { %v1025_v59 = vpop.f32.mrf.mxu1 }
 0x17a   :  { %v1048_v49 = vadd.f32 %v1097_v56, %v1037_v58  ;;  %v1036_v60 = vadd.f32 %v1025_v59, %v923_v54 }
 0x17c   :  { %v1052_v61 = vmax.f32 %v1048_v49, 0.0  ;;  %v1047_v62 = vadd.f32 %v1097_v56, %v1036_v60 }
 0x17e   :  { %1056 = vst [vmem:[%s1839_s3 + $0x18] sm:$0xff] %v1052_v61  ;;  %v1051_v63 = vmax.f32 %v1047_v62, 0.0  ;;  %v1400_v1 = vpop.f32.mrf.mxu0 }
 0x17f   :  { %v1035_v2 = vadd.f32 %v1400_v1, %v922_v0 }
 0x180   :  { %1055 = vst [vmem:[%s1839_s3 + $0x10] sm:$0xff] %v1051_v63  ;;  %v1015_v4 = vpop.f32.mrf.mxu0 }
 0x181   :  { %v1046_v5 = vadd.f32 %v1097_v56, %v1035_v2  ;;  %v1034_v6 = vadd.f32 %v1015_v4, %v921_v3 }
 0x183   :  { %v1050_v7 = vmax.f32 %v1046_v5, 0.0  ;;  %v1045_v8 = vadd.f32 %v1097_v56, %v1034_v6 }
 0x185   :  { %1054 = vst [vmem:[%s1839_s3 + $0x8] sm:$0xff] %v1050_v7  ;;  %v1049_v9 = vmax.f32 %v1045_v8, 0.0 }
 0x187   :  { %1053 = vst [vmem:[%s1839_s3] sm:$0xff] %v1049_v9 }

</bundles_post_ra>
